<compile_context>
chip_gen: v7x
topology: tpu7x:2x2x1
jax: 0.10.0
libtpu: 0.0.40
codegen_flags: <defaults>
</compile_context>

<pallas_src>
import functools

import jax
import jax.numpy as jnp
import numpy as np
from jax import lax
from jax.experimental import pallas as pl
from jax.experimental.pallas import tpu as pltpu


def _pif_kernel(proj_ref, pts_ref, img_ref, out_ref, cmask_ref, pt_ref, *,
                height, width, H_img, W_img, W_pad, tile_rows, mask_dtype):
    # proj_ref : (1, 3, 4)          f32 projection matrix for this view
    # pts_ref  : (8, TP)            f32 rows 0..2 = x, y, z (lane = point)
    # img_ref  : (1, Cp, TH*W_pad)  bf16 flattened image row-tile (lane = HW)
    # out_ref  : (1, Cp, TP)        f32, accumulated across the HW-tile axis
    # cmask_ref: (W_pad, TP)        scratch: column one-hot * wx weights
    # pt_ref   : (8, TP)            scratch: rows 0..3 = y0, y1, wy0, wy1
    k = pl.program_id(2)
    TP = pts_ref.shape[1]
    TH = tile_rows

    @pl.when(k == 0)
    def _init():
        out_ref[...] = jnp.zeros_like(out_ref)

        x = pts_ref[0:1, :]
        y = pts_ref[1:2, :]
        z = pts_ref[2:3, :]
        pm = proj_ref[0]                                      # (3, 4) f32

        def row(r):          # explicit f32 VPU FMAs (no MXU, full precision)
            return (pm[r:r + 1, 0:1] * x + pm[r:r + 1, 1:2] * y
                    + pm[r:r + 1, 2:3] * z + pm[r:r + 1, 3:4])

        u_raw = row(0)
        v_raw = row(1)
        w_raw = row(2)

        # Guard w >= 0 (division by ~0 / behind-camera); such points are
        # invalid anyway and their weights are zeroed below.
        w_neg = w_raw < 0.0
        w_safe = jnp.where(w_neg, w_raw, -1.0)
        u = -(u_raw / w_safe) + height          # UVW[...,0]*=-1; += height
        v = v_raw / w_safe

        valid = (u >= 0.0) & (u < height) & (v >= 0.0) & (v < width) & w_neg
        validf = valid.astype(jnp.float32)

        # normalize to grid_sample's [-1, 1] range (exactly as torch does)
        gx = u / (height * 0.5) - 1.0           # grid x -> W axis of image
        gy = v / (width * 0.5) - 1.0            # grid y -> H axis of image

        # align_corners=False unnormalization + border padding clamp
        ix = jnp.clip(((gx + 1.0) * W_img - 1.0) * 0.5, 0.0, W_img - 1.0)
        iy = jnp.clip(((gy + 1.0) * H_img - 1.0) * 0.5, 0.0, H_img - 1.0)

        x0f = jnp.floor(ix)
        y0f = jnp.floor(iy)
        wx1 = ix - x0f
        wx0 = 1.0 - wx1
        wy1 = iy - y0f
        wy0 = 1.0 - wy1
        x0 = x0f.astype(jnp.int32)
        x1 = jnp.minimum(x0 + 1, W_img - 1)
        y1f = jnp.minimum(y0f + 1.0, float(H_img - 1))

        # Fold validity into the row weights: invalid points contribute
        # nothing and never reach the gather.
        wy0 = wy0 * validf
        wy1 = wy1 * validf

        # column one-hot * wx weights; padded columns [W_img, W_pad) stay 0
        col_iota = lax.broadcasted_iota(jnp.int32, (W_pad, TP), 0)
        cmask = ((col_iota == x0).astype(jnp.float32) * wx0
                 + (col_iota == x1).astype(jnp.float32) * wx1)
        cmask_ref[...] = cmask.astype(mask_dtype)

        pt_ref[0:1, :] = y0f
        pt_ref[1:2, :] = y1f
        pt_ref[2:3, :] = wy0
        pt_ref[3:4, :] = wy1

    # ---- per HW-tile: row mask + factored one-hot gather matmul ------------
    y0f = pt_ref[0:1, :]
    y1f = pt_ref[1:2, :]
    wy0 = pt_ref[2:3, :]
    wy1 = pt_ref[3:4, :]

    row_iota = (lax.broadcasted_iota(jnp.int32, (TH, TP), 0)
                + k * TH).astype(jnp.float32)
    rmask = ((row_iota == y0f).astype(jnp.float32) * wy0
             + (row_iota == y1f).astype(jnp.float32) * wy1).astype(mask_dtype)
    cmask = cmask_ref[...]

    # W[(r,c), p] = R[r, p] * C[c, p]; bf16 on v6e/v7x (native VALU), f32 on v5e
    wmat = (rmask[:, None, :] * cmask[None, :, :]).reshape(TH * W_pad, TP)
    wmat = wmat.astype(jnp.bfloat16)

    # (Cp, THW) bf16 x (THW, TP) bf16 -> (Cp, TP) f32 on the MXU; P is the
    # lane/N dimension, accumulated across HW tiles into the resident block.
    acc = jnp.dot(img_ref[0], wmat, preferred_element_type=jnp.float32)
    out_ref[...] += acc[None, :, :]


def make_proj_mat(focal_length, principal_point, c2w):
    """Replicates PIF.__init__ projection-matrix construction (glue, plain JAX)."""
    K = jnp.zeros((4, 4), jnp.float32)
    K = K.at[0, 0].set(focal_length[0])
    K = K.at[1, 1].set(focal_length[1])
    K = K.at[2, 2].set(1.0)
    K = K.at[0, 2].set(principal_point[0])
    K = K.at[1, 2].set(principal_point[1])
    K = K.at[3, 3].set(1.0)
    w2c = jnp.linalg.inv(c2w)                                 # (Nv, 4, 4)
    return jnp.einsum("ij,njk->nik", K[:3, :], w2c)           # (Nv, 3, 4)


def _round_up(x, m):
    return (x + m - 1) // m * m


def _device_is_v5():
    try:
        kind = jax.devices()[0].device_kind.lower()
    except Exception:
        return False
    return "v5" in kind


def _pick_tile_rows(H_img, W_layout, max_tile_elems):
    """Largest row-tile TH dividing H_img with TH*W_layout a multiple of 128."""
    best = None
    for th in range(1, H_img + 1):
        if (H_img % th == 0 and (th * W_layout) % 128 == 0
                and th * W_layout <= max_tile_elems):
            best = th
    return best if best is not None else H_img   # fallback: whole image


def pif_forward(points_xyz, proj_mat, imgs, image_size, *,
                tile_p=None, tile_rows=None, max_tile_elems=8192):
    """points_xyz: (P,3); proj_mat: (Nv,3,4); imgs: (Nv,C,H,W) -> (Nv,P,C)."""
    width, height = float(image_size[0]), float(image_size[1])
    Nv, C, H_img, W_img = imgs.shape
    P = points_xyz.shape[0]

    is_v5 = _device_is_v5()
    # v6e/v7x MXU is 2x256x256 -> 256-wide point tiles; v5e MXU is 128-wide.
    if tile_p is None:
        tile_p = 128 if is_v5 else 256
    # v7x has 2 TCs: keep >= 2 'parallel' grid slices when P / Nv is tiny.
    if tile_p > 128 and Nv * pl.cdiv(P, tile_p) < 2 <= Nv * pl.cdiv(P, 128):
        tile_p = 128
    # v5e has no native bf16 VALU -> keep mask math in f32 there.
    mask_dtype = jnp.float32 if is_v5 else jnp.bfloat16
    mask_bytes = 4 if is_v5 else 2

    # Pad channels to full f32 sublanes and width to the bf16 sublane pack so
    # the in-kernel (TH, W, TP) -> (TH*W, TP) merge is layout preserving.
    C_pad = _round_up(C, 8)
    W_pad = _round_up(W_img, 16)

    if tile_rows is None:
        tile_rows = _pick_tile_rows(H_img, W_pad, max_tile_elems)
    assert H_img % tile_rows == 0, "tile_rows must divide image height"
    THW = tile_rows * W_pad
    assert THW % 128 == 0 or tile_rows == H_img, "HW tile must be lane aligned"

    # Points: (x, y, z, 0, 0, 0, 0, 0) rows -> full-sublane (8, P_pad) slab.
    P_pad = pl.cdiv(P, tile_p) * tile_p
    pts_t = jnp.pad(points_xyz.astype(jnp.float32).T,
                    ((0, 5), (0, P_pad - P)))                 # (8, P_pad)

    # bf16 image slab (halves HBM/VMEM traffic); zero-pad channels + width.
    imgs_p = jnp.pad(imgs.astype(jnp.bfloat16),
                     ((0, 0), (0, C_pad - C), (0, 0), (0, W_pad - W_img)))
    imgs_flat = imgs_p.reshape(Nv, C_pad, H_img * W_pad)

    kernel = functools.partial(
        _pif_kernel, height=height, width=width, H_img=H_img, W_img=W_img,
        W_pad=W_pad, tile_rows=tile_rows, mask_dtype=mask_dtype)

    grid = (Nv, P_pad // tile_p, H_img // tile_rows)

    # rough VMEM budget: double-buffered bf16 image tile + wmat intermediate
    # + scratch + resident out block; cap well under v7x's 64 MiB physical.
    est = (2 * C_pad * THW * 2 + THW * tile_p * 2
           + W_pad * tile_p * mask_bytes + 8 * tile_p * 4
           + 2 * C_pad * tile_p * 4)
    vmem_limit = int(min(max(32 << 20, 2 * est), 56 << 20))

    out = pl.pallas_call(
        kernel,
        out_shape=jax.ShapeDtypeStruct((Nv, C_pad, P_pad), jnp.float32),
        grid_spec=pltpu.PrefetchScalarGridSpec(
            num_scalar_prefetch=0,
            grid=grid,
            in_specs=[
                pl.BlockSpec((1, 3, 4), lambda v, p, k: (v, 0, 0)),
                pl.BlockSpec((8, tile_p), lambda v, p, k: (0, p)),
                pl.BlockSpec((1, C_pad, THW), lambda v, p, k: (v, 0, k)),
            ],
            out_specs=pl.BlockSpec((1, C_pad, tile_p),
                                   lambda v, p, k: (v, 0, p)),
            scratch_shapes=[
                pltpu.VMEM((W_pad, tile_p), mask_dtype),   # cmask (k-invariant)
                pltpu.VMEM((8, tile_p), jnp.float32),      # y0/y1/wy0/wy1
            ],
        ),
        compiler_params=pltpu.CompilerParams(
            dimension_semantics=("parallel", "parallel", "arbitrary"),
            vmem_limit_bytes=vmem_limit,
        ),
    )(proj_mat.astype(jnp.float32), pts_t, imgs_flat)

    # (Nv, C_pad, P_pad) -> torch layout (Nv, P, C)
    return jnp.transpose(out[:, :C, :P], (0, 2, 1))


def pif_forward_ref(points_xyz, proj_mat, imgs, image_size):
    """Pure-JAX port of the torch forward (used only to validate the kernel)."""
    width, height = float(image_size[0]), float(image_size[1])
    Nv, C, H_img, W_img = imgs.shape
    pts_ext = jnp.concatenate([points_xyz, jnp.ones_like(points_xyz[:, :1])], -1)
    uvw = jnp.einsum("ijk,lk->ilj", proj_mat, pts_ext,
                     precision=lax.Precision.HIGHEST)          # (Nv, P, 3)
    w = uvw[..., 2]
    u = -(uvw[..., 0] / w) + height
    v = uvw[..., 1] / w
    valid = (u >= 0) & (u < height) & (v >= 0) & (v < width) & (w < 0)
    gx = u / (height / 2.0) - 1.0
    gy = v / (width / 2.0) - 1.0
    ix = jnp.clip(((gx + 1.0) * W_img - 1.0) * 0.5, 0.0, W_img - 1.0)
    iy = jnp.clip(((gy + 1.0) * H_img - 1.0) * 0.5, 0.0, H_img - 1.0)
    x0 = jnp.floor(ix).astype(jnp.int32)
    y0 = jnp.floor(iy).astype(jnp.int32)
    wx1 = ix - x0
    wx0 = 1.0 - wx1
    wy1 = iy - y0
    wy0 = 1.0 - wy1
    x1 = jnp.minimum(x0 + 1, W_img - 1)
    y1 = jnp.minimum(y0 + 1, H_img - 1)
    imgs_hwc = jnp.transpose(imgs, (0, 2, 3, 1))               # (Nv, H, W, C)
    gather = jax.vmap(lambda im, yi, xi: im[yi, xi])           # per-view gather
    feats = (gather(imgs_hwc, y0, x0) * (wy0 * wx0)[..., None]
             + gather(imgs_hwc, y0, x1) * (wy0 * wx1)[..., None]
             + gather(imgs_hwc, y1, x0) * (wy1 * wx0)[..., None]
             + gather(imgs_hwc, y1, x1) * (wy1 * wx1)[..., None])
    return feats * valid[..., None].astype(jnp.float32)


if __name__ == "__main__":
    key = jax.random.PRNGKey(0)
    k_pts, k_img = jax.random.split(key)

    Nv, C, H, W, P = 2, 4, 16, 32, 256
    image_size = (W, H)  # (width, height), as in the torch module

    focal_length = jnp.array([16.0, 16.0], jnp.float32)
    principal_point = jnp.array([8.0, 8.0], jnp.float32)

    # two cameras looking down -z at the origin (so w < 0 and points land in-frame)
    def cam(tx, ty, tz):
        m = jnp.eye(4, dtype=jnp.float32)
        return m.at[0, 3].set(tx).at[1, 3].set(ty).at[2, 3].set(tz)

    c2w = jnp.stack([cam(0.0, 0.0, 2.0), cam(0.2, -0.1, 2.5)], axis=0)  # (Nv,4,4)

    points_xyz = jax.random.uniform(k_pts, (P, 3), jnp.float32, -0.5, 0.5)
    imgs = jax.random.normal(k_img, (Nv, C, H, W), jnp.float32)
    # Note: update_imgs does imgs.squeeze(0); with Nv>1 it is a no-op.

    proj_mat = make_proj_mat(focal_length, principal_point, c2w)

    # tile_rows=8 -> 2 HW accumulation steps (exercises the k==0 hoist path);
    # tile_p picked per chip generation (256 on v6e/v7x, 128 on v5e).
    feats = pif_forward(points_xyz, proj_mat, imgs, image_size, tile_rows=8)
    feats = jax.block_until_ready(feats)

    feats_ref = pif_forward_ref(points_xyz, proj_mat, imgs, image_size)

    assert feats.shape == (Nv, P, C)
    assert np.isfinite(np.asarray(feats)).all()
    # Tolerance reflects bf16 MXU operands (image + bilinear weights); the
    # f32 reference uses full-precision gathers.
    np.testing.assert_allclose(np.asarray(feats), np.asarray(feats_ref),
                               rtol=2e-2, atol=2e-2)

    # TODO(synk): aggregate() (argsort-based top-k gather across views) is not
    # part of the default forward path (aggregate=False) and is left out.
    print("KERNEL_OK")
</pallas_src>

<mosaic_0001>
module attributes {stable_mosaic.version = 11 : i64} {
  func.func @_pif_kernel(%arg0: i32, %arg1: i32, %arg2: i32, %arg3: memref<1x3x4xf32, #tpu.memory_space<vmem>>, %arg4: memref<8x256xf32, #tpu.memory_space<vmem>>, %arg5: memref<1x8x256xbf16, #tpu.memory_space<vmem>>, %arg6: memref<1x8x256xf32, #tpu.memory_space<vmem>>, %arg7: memref<32x256xbf16, #tpu.memory_space<vmem>>, %arg8: memref<8x256xf32, #tpu.memory_space<vmem>>) attributes {dimension_semantics = [#tpu.dimension_semantics<parallel>, #tpu.dimension_semantics<parallel>, #tpu.dimension_semantics<arbitrary>], iteration_bounds = array<i64: 2, 1, 2>, scalar_prefetch = 0 : i64, scratch_operands = 2 : i64, tpu.core_type = #tpu.core_type<tc>, window_params = [{transform_indices = @transform_0, window_bounds = array<i64: 1, 3, 4>}, {transform_indices = @transform_1, window_bounds = array<i64: 8, 256>}, {transform_indices = @transform_2, window_bounds = array<i64: 1, 8, 256>}, {transform_indices = @transform_3, window_bounds = array<i64: 1, 8, 256>}]} {
    %c0_i32 = arith.constant 0 : i32
    %0 = arith.cmpi eq, %arg2, %c0_i32 : i32
    %1 = arith.extui %0 : i1 to i32
    %c0_i32_0 = arith.constant 0 : i32
    %2 = arith.cmpi ne, %1, %c0_i32_0 : i32
    scf.if %2 {
      %cst_16 = arith.constant 0.000000e+00 : f32
      %40 = vector.broadcast %cst_16 : f32 to vector<1x8x256xf32>
      %c0_17 = arith.constant 0 : index
      %c0_18 = arith.constant 0 : index
      %c0_19 = arith.constant 0 : index
      %41 = vector.load %arg6[%c0_17, %c0_18, %c0_19] : memref<1x8x256xf32, #tpu.memory_space<vmem>>, vector<1x8x256xf32>
      tpu.vector_store %arg6[%c0_17, %c0_18, %c0_19], %40 {strides = array<i32>} : memref<1x8x256xf32, #tpu.memory_space<vmem>>, vector<1x8x256xf32>,
      %c0_20 = arith.constant 0 : index
      %c0_21 = arith.constant 0 : index
      %42 = vector.load %arg4[%c0_20, %c0_21] : memref<8x256xf32, #tpu.memory_space<vmem>>, vector<1x256xf32>
      %c1_22 = arith.constant 1 : index
      %c0_23 = arith.constant 0 : index
      %43 = vector.load %arg4[%c1_22, %c0_23] : memref<8x256xf32, #tpu.memory_space<vmem>>, vector<1x256xf32>
      %c2_24 = arith.constant 2 : index
      %c0_25 = arith.constant 0 : index
      %44 = vector.load %arg4[%c2_24, %c0_25] : memref<8x256xf32, #tpu.memory_space<vmem>>, vector<1x256xf32>
      %c0_26 = arith.constant 0 : index
      %c0_27 = arith.constant 0 : index
      %c0_28 = arith.constant 0 : index
      %45 = vector.load %arg3[%c0_26, %c0_27, %c0_28] : memref<1x3x4xf32, #tpu.memory_space<vmem>>, vector<1x3x4xf32>
      %46 = vector.shape_cast %45 : vector<1x3x4xf32> to vector<3x4xf32>
      %47 = vector.extract_strided_slice %46 {offsets = [0, 0], sizes = [1, 1], strides = [1, 1]} : vector<3x4xf32> to vector<1x1xf32>
      %48 = vector.broadcast %47 : vector<1x1xf32> to vector<1x256xf32>
      %49 = arith.mulf %48, %42 : vector<1x256xf32>
      %50 = vector.extract_strided_slice %46 {offsets = [0, 1], sizes = [1, 1], strides = [1, 1]} : vector<3x4xf32> to vector<1x1xf32>
      %51 = vector.broadcast %50 : vector<1x1xf32> to vector<1x256xf32>
      %52 = arith.mulf %51, %43 : vector<1x256xf32>
      %53 = arith.addf %49, %52 : vector<1x256xf32>
      %54 = vector.extract_strided_slice %46 {offsets = [0, 2], sizes = [1, 1], strides = [1, 1]} : vector<3x4xf32> to vector<1x1xf32>
      %55 = vector.broadcast %54 : vector<1x1xf32> to vector<1x256xf32>
      %56 = arith.mulf %55, %44 : vector<1x256xf32>
      %57 = arith.addf %53, %56 : vector<1x256xf32>
      %58 = vector.extract_strided_slice %46 {offsets = [0, 3], sizes = [1, 1], strides = [1, 1]} : vector<3x4xf32> to vector<1x1xf32>
      %59 = vector.broadcast %58 : vector<1x1xf32> to vector<1x256xf32>
      %60 = arith.addf %57, %59 : vector<1x256xf32>
      %61 = vector.extract_strided_slice %46 {offsets = [1, 0], sizes = [1, 1], strides = [1, 1]} : vector<3x4xf32> to vector<1x1xf32>
      %62 = vector.broadcast %61 : vector<1x1xf32> to vector<1x256xf32>
      %63 = arith.mulf %62, %42 : vector<1x256xf32>
      %64 = vector.extract_strided_slice %46 {offsets = [1, 1], sizes = [1, 1], strides = [1, 1]} : vector<3x4xf32> to vector<1x1xf32>
      %65 = vector.broadcast %64 : vector<1x1xf32> to vector<1x256xf32>
      %66 = arith.mulf %65, %43 : vector<1x256xf32>
      %67 = arith.addf %63, %66 : vector<1x256xf32>
      %68 = vector.extract_strided_slice %46 {offsets = [1, 2], sizes = [1, 1], strides = [1, 1]} : vector<3x4xf32> to vector<1x1xf32>
      %69 = vector.broadcast %68 : vector<1x1xf32> to vector<1x256xf32>
      %70 = arith.mulf %69, %44 : vector<1x256xf32>
      %71 = arith.addf %67, %70 : vector<1x256xf32>
      %72 = vector.extract_strided_slice %46 {offsets = [1, 3], sizes = [1, 1], strides = [1, 1]} : vector<3x4xf32> to vector<1x1xf32>
      %73 = vector.broadcast %72 : vector<1x1xf32> to vector<1x256xf32>
      %74 = arith.addf %71, %73 : vector<1x256xf32>
      %75 = vector.extract_strided_slice %46 {offsets = [2, 0], sizes = [1, 1], strides = [1, 1]} : vector<3x4xf32> to vector<1x1xf32>
      %76 = vector.broadcast %75 : vector<1x1xf32> to vector<1x256xf32>
      %77 = arith.mulf %76, %42 : vector<1x256xf32>
      %78 = vector.extract_strided_slice %46 {offsets = [2, 1], sizes = [1, 1], strides = [1, 1]} : vector<3x4xf32> to vector<1x1xf32>
      %79 = vector.broadcast %78 : vector<1x1xf32> to vector<1x256xf32>
      %80 = arith.mulf %79, %43 : vector<1x256xf32>
      %81 = arith.addf %77, %80 : vector<1x256xf32>
      %82 = vector.extract_strided_slice %46 {offsets = [2, 2], sizes = [1, 1], strides = [1, 1]} : vector<3x4xf32> to vector<1x1xf32>
      %83 = vector.broadcast %82 : vector<1x1xf32> to vector<1x256xf32>
      %84 = arith.mulf %83, %44 : vector<1x256xf32>
      %85 = arith.addf %81, %84 : vector<1x256xf32>
      %86 = vector.extract_strided_slice %46 {offsets = [2, 3], sizes = [1, 1], strides = [1, 1]} : vector<3x4xf32> to vector<1x1xf32>
      %87 = vector.broadcast %86 : vector<1x1xf32> to vector<1x256xf32>
      %88 = arith.addf %85, %87 : vector<1x256xf32>
      %cst_29 = arith.constant 0.000000e+00 : f32
      %89 = vector.broadcast %cst_29 : f32 to vector<1x256xf32>
      %90 = arith.cmpf olt, %88, %89 : vector<1x256xf32>
      %cst_30 = arith.constant -1.000000e+00 : f32
      %91 = vector.broadcast %cst_30 : f32 to vector<1x256xf32>
      %92 = arith.select %90, %88, %91 : vector<1x256xi1>, vector<1x256xf32>
      %93 = arith.divf %60, %92 : vector<1x256xf32>
      %cst_31 = arith.constant 0.000000e+00 : f32
      %94 = vector.broadcast %cst_31 : f32 to vector<1x256xf32>
      %95 = arith.subf %94, %93 : vector<1x256xf32>
      %cst_32 = arith.constant 1.600000e+01 : f32
      %96 = vector.broadcast %cst_32 : f32 to vector<1x256xf32>
      %97 = arith.addf %95, %96 : vector<1x256xf32>
      %98 = arith.divf %74, %92 : vector<1x256xf32>
      %cst_33 = arith.constant 0.000000e+00 : f32
      %99 = vector.broadcast %cst_33 : f32 to vector<1x256xf32>
      %100 = arith.cmpf oge, %97, %99 : vector<1x256xf32>
      %cst_34 = arith.constant 1.600000e+01 : f32
      %101 = vector.broadcast %cst_34 : f32 to vector<1x256xf32>
      %102 = arith.cmpf olt, %97, %101 : vector<1x256xf32>
      %103 = arith.andi %100, %102 : vector<1x256xi1>
      %cst_35 = arith.constant 0.000000e+00 : f32
      %104 = vector.broadcast %cst_35 : f32 to vector<1x256xf32>
      %105 = arith.cmpf oge, %98, %104 : vector<1x256xf32>
      %106 = arith.andi %103, %105 : vector<1x256xi1>
      %cst_36 = arith.constant 3.200000e+01 : f32
      %107 = vector.broadcast %cst_36 : f32 to vector<1x256xf32>
      %108 = arith.cmpf olt, %98, %107 : vector<1x256xf32>
      %109 = arith.andi %106, %108 : vector<1x256xi1>
      %110 = arith.andi %109, %90 : vector<1x256xi1>
      %111 = arith.extui %110 : vector<1x256xi1> to vector<1x256xi32>
      %112 = arith.sitofp %111 : vector<1x256xi32> to vector<1x256xf32>
      %cst_37 = arith.constant 8.000000e+00 : f32
      %113 = vector.broadcast %cst_37 : f32 to vector<1x256xf32>
      %114 = arith.divf %97, %113 : vector<1x256xf32>
      %cst_38 = arith.constant 1.000000e+00 : f32
      %115 = vector.broadcast %cst_38 : f32 to vector<1x256xf32>
      %116 = arith.subf %114, %115 : vector<1x256xf32>
      %cst_39 = arith.constant 1.600000e+01 : f32
      %117 = vector.broadcast %cst_39 : f32 to vector<1x256xf32>
      %118 = arith.divf %98, %117 : vector<1x256xf32>
      %cst_40 = arith.constant 1.000000e+00 : f32
      %119 = vector.broadcast %cst_40 : f32 to vector<1x256xf32>
      %120 = arith.subf %118, %119 : vector<1x256xf32>
      %cst_41 = arith.constant 1.000000e+00 : f32
      %121 = vector.broadcast %cst_41 : f32 to vector<1x256xf32>
      %122 = arith.addf %116, %121 : vector<1x256xf32>
      %cst_42 = arith.constant 3.200000e+01 : f32
      %123 = vector.broadcast %cst_42 : f32 to vector<1x256xf32>
      %124 = arith.mulf %122, %123 : vector<1x256xf32>
      %cst_43 = arith.constant 1.000000e+00 : f32
      %125 = vector.broadcast %cst_43 : f32 to vector<1x256xf32>
      %126 = arith.subf %124, %125 : vector<1x256xf32>
      %cst_44 = arith.constant 5.000000e-01 : f32
      %127 = vector.broadcast %cst_44 : f32 to vector<1x256xf32>
      %128 = arith.mulf %126, %127 : vector<1x256xf32>
      %cst_45 = arith.constant 0.000000e+00 : f32
      %cst_46 = arith.constant 3.100000e+01 : f32
      %129 = vector.broadcast %cst_45 : f32 to vector<1x256xf32>
      %130 = arith.maximumf %129, %128 : vector<1x256xf32>
      %131 = vector.broadcast %cst_46 : f32 to vector<1x256xf32>
      %132 = arith.minimumf %131, %130 : vector<1x256xf32>
      %cst_47 = arith.constant 1.000000e+00 : f32
      %133 = vector.broadcast %cst_47 : f32 to vector<1x256xf32>
      %134 = arith.addf %120, %133 : vector<1x256xf32>
      %cst_48 = arith.constant 1.600000e+01 : f32
      %135 = vector.broadcast %cst_48 : f32 to vector<1x256xf32>
      %136 = arith.mulf %134, %135 : vector<1x256xf32>
      %cst_49 = arith.constant 1.000000e+00 : f32
      %137 = vector.broadcast %cst_49 : f32 to vector<1x256xf32>
      %138 = arith.subf %136, %137 : vector<1x256xf32>
      %cst_50 = arith.constant 5.000000e-01 : f32
      %139 = vector.broadcast %cst_50 : f32 to vector<1x256xf32>
      %140 = arith.mulf %138, %139 : vector<1x256xf32>
      %cst_51 = arith.constant 0.000000e+00 : f32
      %cst_52 = arith.constant 1.500000e+01 : f32
      %141 = vector.broadcast %cst_51 : f32 to vector<1x256xf32>
      %142 = arith.maximumf %141, %140 : vector<1x256xf32>
      %143 = vector.broadcast %cst_52 : f32 to vector<1x256xf32>
      %144 = arith.minimumf %143, %142 : vector<1x256xf32>
      %145 = math.floor %132 : vector<1x256xf32>
      %146 = math.floor %144 : vector<1x256xf32>
      %147 = arith.subf %132, %145 : vector<1x256xf32>
      %cst_53 = arith.constant 1.000000e+00 : f32
      %148 = vector.broadcast %cst_53 : f32 to vector<1x256xf32>
      %149 = arith.subf %148, %147 : vector<1x256xf32>
      %150 = arith.subf %144, %146 : vector<1x256xf32>
      %cst_54 = arith.constant 1.000000e+00 : f32
      %151 = vector.broadcast %cst_54 : f32 to vector<1x256xf32>
      %152 = arith.subf %151, %150 : vector<1x256xf32>
      %153 = arith.fptosi %145 : vector<1x256xf32> to vector<1x256xi32>
      %c1_i32 = arith.constant 1 : i32
      %154 = vector.broadcast %c1_i32 : i32 to vector<1x256xi32>
      %155 = arith.addi %153, %154 : vector<1x256xi32>
      %c31_i32 = arith.constant 31 : i32
      %156 = vector.broadcast %c31_i32 : i32 to vector<1x256xi32>
      %157 = arith.minsi %155, %156 : vector<1x256xi32>
      %cst_55 = arith.constant 1.000000e+00 : f32
      %158 = vector.broadcast %cst_55 : f32 to vector<1x256xf32>
      %159 = arith.addf %146, %158 : vector<1x256xf32>
      %cst_56 = arith.constant 1.500000e+01 : f32
      %160 = vector.broadcast %cst_56 : f32 to vector<1x256xf32>
      %161 = arith.minimumf %159, %160 : vector<1x256xf32>
      %162 = arith.mulf %152, %112 : vector<1x256xf32>
      %163 = arith.mulf %150, %112 : vector<1x256xf32>
      %164 = tpu.iota {dimensions = array<i32: 0>} : vector<32x256xi32>
      %165 = vector.broadcast %153 : vector<1x256xi32> to vector<32x256xi32>
      %166 = arith.cmpi eq, %164, %165 : vector<32x256xi32>
      %167 = arith.extui %166 : vector<32x256xi1> to vector<32x256xi32>
      %168 = arith.sitofp %167 : vector<32x256xi32> to vector<32x256xf32>
      %169 = vector.broadcast %149 : vector<1x256xf32> to vector<32x256xf32>
      %170 = arith.mulf %168, %169 : vector<32x256xf32>
      %171 = vector.broadcast %157 : vector<1x256xi32> to vector<32x256xi32>
      %172 = arith.cmpi eq, %164, %171 : vector<32x256xi32>
      %173 = arith.extui %172 : vector<32x256xi1> to vector<32x256xi32>
      %174 = arith.sitofp %173 : vector<32x256xi32> to vector<32x256xf32>
      %175 = vector.broadcast %147 : vector<1x256xf32> to vector<32x256xf32>
      %176 = arith.mulf %174, %175 : vector<32x256xf32>
      %177 = arith.addf %170, %176 : vector<32x256xf32>
      %178 = arith.truncf %177 : vector<32x256xf32> to vector<32x256xbf16>
      %c0_57 = arith.constant 0 : index
      %c0_58 = arith.constant 0 : index
      %179 = vector.load %arg7[%c0_57, %c0_58] : memref<32x256xbf16, #tpu.memory_space<vmem>>, vector<32x256xbf16>
      tpu.vector_store %arg7[%c0_57, %c0_58], %178 {strides = array<i32>} : memref<32x256xbf16, #tpu.memory_space<vmem>>, vector<32x256xbf16>,
      %c0_59 = arith.constant 0 : index
      %c0_60 = arith.constant 0 : index
      %180 = vector.load %arg8[%c0_59, %c0_60] : memref<8x256xf32, #tpu.memory_space<vmem>>, vector<1x256xf32>
      tpu.vector_store %arg8[%c0_59, %c0_60], %146 {strides = array<i32>} : memref<8x256xf32, #tpu.memory_space<vmem>>, vector<1x256xf32>,
      %c1_61 = arith.constant 1 : index
      %c0_62 = arith.constant 0 : index
      %181 = vector.load %arg8[%c1_61, %c0_62] : memref<8x256xf32, #tpu.memory_space<vmem>>, vector<1x256xf32>
      tpu.vector_store %arg8[%c1_61, %c0_62], %161 {strides = array<i32>} : memref<8x256xf32, #tpu.memory_space<vmem>>, vector<1x256xf32>,
      %c2_63 = arith.constant 2 : index
      %c0_64 = arith.constant 0 : index
      %182 = vector.load %arg8[%c2_63, %c0_64] : memref<8x256xf32, #tpu.memory_space<vmem>>, vector<1x256xf32>
      tpu.vector_store %arg8[%c2_63, %c0_64], %162 {strides = array<i32>} : memref<8x256xf32, #tpu.memory_space<vmem>>, vector<1x256xf32>,
      %c3_65 = arith.constant 3 : index
      %c0_66 = arith.constant 0 : index
      %183 = vector.load %arg8[%c3_65, %c0_66] : memref<8x256xf32, #tpu.memory_space<vmem>>, vector<1x256xf32>
      tpu.vector_store %arg8[%c3_65, %c0_66], %163 {strides = array<i32>} : memref<8x256xf32, #tpu.memory_space<vmem>>, vector<1x256xf32>,
    } else {
    }
    %c0 = arith.constant 0 : index
    %c0_1 = arith.constant 0 : index
    %3 = vector.load %arg8[%c0, %c0_1] : memref<8x256xf32, #tpu.memory_space<vmem>>, vector<1x256xf32>
    %c1 = arith.constant 1 : index
    %c0_2 = arith.constant 0 : index
    %4 = vector.load %arg8[%c1, %c0_2] : memref<8x256xf32, #tpu.memory_space<vmem>>, vector<1x256xf32>
    %c2 = arith.constant 2 : index
    %c0_3 = arith.constant 0 : index
    %5 = vector.load %arg8[%c2, %c0_3] : memref<8x256xf32, #tpu.memory_space<vmem>>, vector<1x256xf32>
    %c3 = arith.constant 3 : index
    %c0_4 = arith.constant 0 : index
    %6 = vector.load %arg8[%c3, %c0_4] : memref<8x256xf32, #tpu.memory_space<vmem>>, vector<1x256xf32>
    %7 = tpu.iota {dimensions = array<i32: 0>} : vector<8x256xi32>
    %c8_i32 = arith.constant 8 : i32
    %8 = arith.muli %arg2, %c8_i32 : i32
    %9 = vector.broadcast %8 : i32 to vector<8x256xi32>
    %10 = arith.addi %7, %9 : vector<8x256xi32>
    %11 = arith.sitofp %10 : vector<8x256xi32> to vector<8x256xf32>
    %12 = vector.broadcast %3 : vector<1x256xf32> to vector<8x256xf32>
    %13 = arith.cmpf oeq, %11, %12 : vector<8x256xf32>
    %14 = arith.extui %13 : vector<8x256xi1> to vector<8x256xi32>
    %15 = arith.sitofp %14 : vector<8x256xi32> to vector<8x256xf32>
    %16 = vector.broadcast %5 : vector<1x256xf32> to vector<8x256xf32>
    %17 = arith.mulf %15, %16 : vector<8x256xf32>
    %18 = vector.broadcast %4 : vector<1x256xf32> to vector<8x256xf32>
    %19 = arith.cmpf oeq, %11, %18 : vector<8x256xf32>
    %20 = arith.extui %19 : vector<8x256xi1> to vector<8x256xi32>
    %21 = arith.sitofp %20 : vector<8x256xi32> to vector<8x256xf32>
    %22 = vector.broadcast %6 : vector<1x256xf32> to vector<8x256xf32>
    %23 = arith.mulf %21, %22 : vector<8x256xf32>
    %24 = arith.addf %17, %23 : vector<8x256xf32>
    %25 = arith.truncf %24 : vector<8x256xf32> to vector<8x256xbf16>
    %c0_5 = arith.constant 0 : index
    %c0_6 = arith.constant 0 : index
    %26 = vector.load %arg7[%c0_5, %c0_6] : memref<32x256xbf16, #tpu.memory_space<vmem>>, vector<32x256xbf16>
    %27 = vector.shape_cast %25 : vector<8x256xbf16> to vector<8x1x256xbf16>
    %28 = vector.shape_cast %26 : vector<32x256xbf16> to vector<1x32x256xbf16>
    %29 = vector.broadcast %27 : vector<8x1x256xbf16> to vector<8x32x256xbf16>
    %30 = vector.broadcast %28 : vector<1x32x256xbf16> to vector<8x32x256xbf16>
    %31 = arith.mulf %29, %30 : vector<8x32x256xbf16>
    %32 = vector.shape_cast %31 : vector<8x32x256xbf16> to vector<256x256xbf16>
    %c0_7 = arith.constant 0 : index
    %c0_8 = arith.constant 0 : index
    %c0_9 = arith.constant 0 : index
    %33 = vector.load %arg5[%c0_7, %c0_8, %c0_9] : memref<1x8x256xbf16, #tpu.memory_space<vmem>>, vector<1x8x256xbf16>
    %34 = vector.shape_cast %33 : vector<1x8x256xbf16> to vector<8x256xbf16>
    %cst = arith.constant dense<0.000000e+00> : vector<8x256xf32>
    %35 = tpu.matmul %34, %32, %cst {dimension_numbers = #tpu.dot_dimension_numbers<[1], [0], [0], [1], [0, 0, 1, 1], [], []>} : vector<8x256xbf16>, vector<256x256xbf16>, vector<8x256xf32> -> vector<8x256xf32>
    %c0_10 = arith.constant 0 : index
    %c0_11 = arith.constant 0 : index
    %c0_12 = arith.constant 0 : index
    %36 = vector.load %arg6[%c0_10, %c0_11, %c0_12] : memref<1x8x256xf32, #tpu.memory_space<vmem>>, vector<1x8x256xf32>
    %37 = vector.shape_cast %35 : vector<8x256xf32> to vector<1x8x256xf32>
    %38 = arith.addf %36, %37 : vector<1x8x256xf32>
    %c0_13 = arith.constant 0 : index
    %c0_14 = arith.constant 0 : index
    %c0_15 = arith.constant 0 : index
    %39 = vector.load %arg6[%c0_13, %c0_14, %c0_15] : memref<1x8x256xf32, #tpu.memory_space<vmem>>, vector<1x8x256xf32>
    tpu.vector_store %arg6[%c0_13, %c0_14, %c0_15], %38 {strides = array<i32>} : memref<1x8x256xf32, #tpu.memory_space<vmem>>, vector<1x8x256xf32>,
    return
  }
  func.func @transform_0(%arg0: i32, %arg1: i32, %arg2: i32) -> (i32, i32, i32) {
    %c0_i32 = arith.constant 0 : i32
    %c0_i32_0 = arith.constant 0 : i32
    %c0_i32_1 = arith.constant 0 : i32
    return %arg0, %c0_i32, %c0_i32_0 : i32, i32, i32
  }
  func.func @transform_1(%arg0: i32, %arg1: i32, %arg2: i32) -> (i32, i32) {
    %c0_i32 = arith.constant 0 : i32
    %c0_i32_0 = arith.constant 0 : i32
    return %c0_i32, %arg1 : i32, i32
  }
  func.func @transform_2(%arg0: i32, %arg1: i32, %arg2: i32) -> (i32, i32, i32) {
    %c0_i32 = arith.constant 0 : i32
    %c0_i32_0 = arith.constant 0 : i32
    return %arg0, %c0_i32, %arg2 : i32, i32, i32
  }
  func.func @transform_3(%arg0: i32, %arg1: i32, %arg2: i32) -> (i32, i32, i32) {
    %c0_i32 = arith.constant 0 : i32
    %c0_i32_0 = arith.constant 0 : i32
    return %arg0, %c0_i32, %arg1 : i32, i32, i32
  }
}

</mosaic_0001>

<bundles_post_ra>
// kernel: tpu_custom_call.1
= control target key start
LH: loop header
LB: loop body
LE: loop exit
PB: predicated region body
PF: predicated region fallthrough
CT: control target
= control target key end

     0   :  { %8 = vsyncpa [#allocation5], 0  ;;  %s2061_s0 = inlined_call_operand.vmem [shape: f32[2,3,4], index: 0, kind: input, shape index: {}]   ;;  %s2062_s1 = inlined_call_operand.vmem [shape: f32[8,256], index: 1, kind: input, shape index: {}]   ;;  %s2063_s2 = inlined_call_operand.hbm [shape: bf16[2,8,512], index: 2, kind: input, shape index: {}]   ;;  %s2064_s3 = inlined_call_operand.hbm [shape: f32[2,8,256], index: 3, kind: output, shape index: {}]  }
   0x1   :  { %10 = vsyncpa [#allocation5 + $0x1], 0 }
   0x2   :  { %11 = vsyncpa [#allocation6], 0 }
   0x3   :  { %13 = vsyncpa [#allocation6 + $0x1], 0  ;;  %s1561_s12 = smov 0   ;;  %s1563_s13 = smov 0  }
   0x4   :  { %s1565_s14 = smov 0   ;;  %s1567_s15 = smov 0  }
   0x5   :  { %s1569_s16 = smov 0   ;;  %s1571_s17 = smov 0  }
   0x6   :  { %s1573_s18 = smov 0   ;;  %s1575_s19 = smov 0  }
   0x7   :  { %s1577_s20 = smov 0   ;;  %s1579_s21 = smov 0  }
   0x8   :  { %s1581_s22 = smov 0  }
   0x9 LB: > { %s1188_s23 = sadd.s32 4294967295, %s1529_s22   ;;  %s1189_s24 = sadd.s32 4294967294, %s1529_s22   ;;  %s1529_s22 = sphi %s1581_s22, %s19_s22   ;;  %s1525_s21 = sphi %s1579_s21, %s2106_s21   ;;  %s1521_s20 = sphi %s1577_s20, %s2105_s20   ;;  %s1517_s19 = sphi %s1575_s19, %s2104_s19   ;;  %s1513_s18 = sphi %s1573_s18, %s2103_s18   ;;  %s1509_s17 = sphi %s1571_s17, %s2102_s17   ;;  %s1505_s16 = sphi %s1569_s16, %s2101_s16   ;;  %s1501_s15 = sphi %s1567_s15, %s2100_s15   ;;  %s1497_s14 = sphi %s1565_s14, %s2099_s14   ;;  %s1493_s13 = sphi %s1563_s13, %s2098_s13   ;;  %s1489_s12 = sphi %s1561_s12, %s2097_s12  }
   0xa   : > { %s31_s25 = sadd.s32 1, %s1521_s20  ;;  %s38_s26 = sadd.s32 1, %s1525_s21 }
   0xb   : > { %p32_p0 = scmp.ge.s32.totalorder %s31_s25, 2  ;;  %s99_s27 = sadd.s32 1, %s1509_s17 }
   0xc   : > { %p106_p1 = scmp.ne.s32.totalorder %s1509_s17, %s1505_s16  ;;  %p107_p2 = scmp.eq.s32.totalorder %s1529_s22, 0 }
   0xd   : > { %s2108_s25 = smov (%p32_p0, %s31_s25), 0  ;;  %s2110_s26 = smov (!%p32_p0, %s38_s26), %s1525_s21 }
   0xe   : > { %2068 = sst [smem:[#allocation10_spill]] %s2108_s25  ;;  %s95_s28 = ssub.s32 %s1521_s20, %s2108_s25 }
   0xf   : > { %p1627_p3 = por %p107_p2, %p106_p1  ;;  %p40_p4 = scmp.ge.s32.totalorder %s2110_s26, 2 }
  0x10   : > { %p112_p5 = scmp.ne.s32.totalorder %s1505_s16, %s1501_s15  ;;  %p113_p6 = scmp.eq.s32.totalorder %s1188_s23, 0 }
  0x11   : > { %s127_s30 = sadd.s32 1, %s1497_s14  ;;  %s2112_s26 = smov (%p40_p4, %s2110_s26), 0 }
  0x12   : > { %2070 = sst [smem:[#allocation11_spill]] %s2112_s26  ;;  %p1635_p7 = por %p113_p6, %p112_p5 }
  0x13   : > { %p137_p8 = scmp.ne.s32.totalorder %s1497_s14, %s1493_s13  ;;  %s94_s5 = ssub.s32 %s1525_s21, %s2112_s26 }
  0x14   : > { %p138_p9 = scmp.eq.s32.totalorder %s1188_s23, 3  ;;  %s96_s6 = sor.u32 %s95_s28, %s94_s5 }
  0x15   : > { %p125_p10 = scmp.eq.s32.totalorder %s94_s5, 0  ;;  %p97_p11 = scmp.eq.s32.totalorder %s96_s6, 0 }
  0x16   : > { %p1643_p12 = por %p138_p9, %p137_p8  ;;  %p143_p13 = scmp.ne.s32.totalorder %s1493_s13, %s1489_s12 }
  0x17   : > { %s1648_s8 = scalar_select %p125_p10, %s1497_s14, %s127_s30  }
  0x18   : > { %s2072_s7 = scalar_select %p1643_p12, 1, 0 }
  0x19   : > { %s1651_s9 = scalar_select %p97_p11, %s1509_s17, %s99_s27  }
  0x1a   : > { %p144_p0 = scmp.eq.s32.totalorder %s1189_s24, 3  ;;  %p1264_p1 = scmp.lt.s32.totalorder %s1529_s22, 4 }
  0x1b   : > { %2073 = sst [smem:[#allocation12_spill]] %s1651_s9  ;;  %s180_s11 = sand.u32 1, %s1509_s17  }
  0x1c   : > { %p1656_p2 = por %p144_p0, %p143_p13  ;;  %s1193_s15 = sshll.u32 %s180_s11, 3 }
  0x1d   : > { %s1194_s23 = sshll.u32 %s1521_s20, 1  ;;  %s1195_s28 = sshll.u32 %s1525_s21, 2 }
  0x1e   : > { %s2074_s10 = scalar_select %p1656_p2, 1, 0 }
  0x1f   : > { %s184_s5 = scalar_lea.vmem [#allocation4], %s1193_s15  ;;  %s190_s26 = sadd.s32 %s1195_s28, %s1194_s23 }
  0x20   : > { %s194_s6 = sshll.u32 %s184_s5, 4  ;;  %s1196_s27 = sshll.u32 %s190_s26, 6  ;;  %s1663_s6 = int_to_ptr.vmem [resolvable:$true] %s194_s6 }
  0x21   : > { %p1667_p4 = pnand %p1264_p1, %p1627_p3  ;;  %s1674_s9 = scalar_lea.hbm %s2063_s2, %s1196_s27 }
  0x22   : > { %s181_s15 = scalar_lea.sflag [#allocation5], %s180_s11  ;;  %s1377_s26 = scalar_lea.hbm %s1674_s9, 128 }
  0x23   : > { %p1378_p8 = scmp.ne.s32.totalorder %s1674_s9, %s1377_s26  ;;  %p1379_p3 = pneg %p1667_p4 }
  0x24   : > { %s1382_s23 = scalar_lea.hbm %s2063_s2, 512  ;;  %p1383_p11 = scmp.lt.u32.totalorder %s1674_s9, %s2063_s2 }
  0x25   : > { %p1380_p9 = pnand %p1379_p3, %p1378_p8  ;;  %p1384_p13 = scmp.lt.u32.totalorder %s1382_s23, %s1377_s26 }
  0x26   : > { %p1386_p1 = scmp.lt.u32.totalorder %s1377_s26, %s1674_s9 }
  0x27   : > { %p1381_p10 = pneg %p1380_p9  ;;  %p1385_p0 = por %p1384_p13, %p1383_p11 }
  0x29   : > { %p1387_p5 = por %p1386_p1, %p1385_p0 }
  0x2b   : > { %p1388_p6 = pnand %p1387_p5, %p1381_p10 }
  0x2d   : > { %1391 = shalt.err (!%p1388_p6)
}
  0x2e   : > { %s1392_s11 = scalar_lea.vmem %s1663_s6, 128  ;;  %s1531_s27 = smov [#allocation4]  }
  0x2f   : > { %p1393_p8 = scmp.ne.s32.totalorder %s1663_s6, %s1392_s11  ;;  %s1397_s24 = sshll.u32 %s1531_s27, 4  ;;  %s1398_s24 = int_to_ptr.vmem [resolvable:$false] %s1397_s24 }
  0x30   : > { %s1399_s25 = scalar_lea.vmem %s1398_s24, 256  ;;  %p1400_p12 = scmp.lt.s32.totalorder %s1663_s6, %s1398_s24 }
  0x31   : > { %p1395_p9 = pnand %p1393_p8, %p1379_p3  ;;  %p1401_p11 = scmp.lt.s32.totalorder %s1399_s25, %s1392_s11 }
  0x33   : > { %p1396_p2 = pneg %p1395_p9  ;;  %p1402_p13 = por %p1401_p11, %p1400_p12 }
  0x35   : > { %p1403_p0 = pnand %p1402_p13, %p1396_p2 }
  0x37   : > { %1406 = shalt.err (!%p1403_p0)
}
  0x38   : > { %1259 = dma.hbm_to_vmem [thread:$0]  (!%p1667_p4), %s1674_s9, 128, %s1663_s6, %s181_s15  }
  0x39   : > { %p2076_p5 = scmp.lt.s32.totalorder %s1529_s22, 5  ;;  %p2077_p6 = scmp.ge.s32.totalorder %s1529_s22, 1 }
  0x3b   : > { %p200_p3 = pnand %p2077_p6, %p2076_p5 }
  0x3c   : > { %s205_s26 = sand.u32 (!%p200_p3), 1, %s1505_s16  }
  0x3d   : > { %203 = sbr.rel (%p200_p3) target bundleno = 615 (0x267), region = 32  ;;  %s1708_s29 = sshll.u32 (!%p200_p3), %s205_s26, 3 }
  0x3e   : > { %s206_s23 = scalar_lea.sflag (!%p200_p3), [#allocation5], %s205_s26  ;;  %s209_s28 = scalar_lea.vmem (!%p200_p3), [#allocation4], %s1708_s29 }
  0x44   : > { %1480 = dma.done.wait (%p1635_p7), %s206_s23, 128  }
  0x45   : > { %1482 = vsyncadd (%p1635_p7), %s206_s23, 4294967168  ;;  %s238_s9 = sand.u32 1, %s1493_s13   ;;  %p241_p12 = scmp.lt.s32.totalorder %s1517_s19, 1 }
  0x46   : > { %s1199_s6 = sshll.u32 %s238_s9, 4  ;;  %p1201_p2 = scmp.ne.s32.totalorder %s1513_s18, 0 }
  0x47   : > { %s242_s30 = scalar_select %p241_p12, %s1517_s19, 1 }
  0x48   : > { %s1723_s24 = scalar_lea.vmem [#allocation7], %s1199_s6  ;;  %256 = sbr.rel (%p1201_p2) target bundleno = 290 (0x122), region = 40  ;;  %v1532_v1 = vmov (!%p1201_p2), 0   ;;  %v1533_v2 = vmov (!%p1201_p2), 2   ;;  %v1534_v3 = vmov (!%p1201_p2), 1   ;;  %v1535_v4 = vmov (!%p1201_p2), 3  }
  0x49   : > { %s1200_s15 = sshll.u32 %s242_s30, 2  ;;  %1362 = vset.pattern.permute.xlu0 (!%p1201_p2), %v1532_v1  ;;  %1364 = vset.pattern.permute.xlu1 (!%p1201_p2), %v1533_v2  ;;  %v1536_v5 = vmov (!%p1201_p2), 0.0   ;;  %v271_v6 = vlaneseq (!%p1201_p2)  ;;  %v259_v10 = vld [vmem:[%s2062_s1] ss:$8 sm:$0x3] (!%p1201_p2) }
  0x4a   : > { %s244_s27 = scalar_lea.vmem %s2061_s0, %s1200_s15  ;;  %257 = vst [vmem:[%s1723_s24] sm:$0xff] (!%p1201_p2), %v1536_v5  ;;  %258 = vst [vmem:[%s1723_s24 + $0x8] sm:$0xff] (!%p1201_p2), %v1536_v5  ;;  %v1202_v11 = vld [vmem:[%s2062_s1 + $0x1] ss:$8 sm:$0x3] (!%p1201_p2) }
  0x4b   : > { %v264_v0 = vld [vmem:[%s244_s27] sm:$0x7] (!%p1201_p2)  ;;  %v1732_v7 = vshrl.u32 (!%p1201_p2), %v271_v6, 7 }
  0x4c   : > { %267 = vperm.xlu0 (!%p1201_p2), %1362, %v264_v0   ;;  %303 = vperm.xlu1 (!%p1201_p2), %1364, %v264_v0   ;;  %v1203_v12 = vld [vmem:[%s2062_s1 + $0x2] ss:$8 sm:$0x3] (!%p1201_p2) }
  0x4d   : > { %v1735_v8 = vsub.s32 (!%p1201_p2), 0, %v1732_v7  ;;  %v277_v9 = vsub.s32 (!%p1201_p2), 1, %v1732_v7 }
  0x4f   : > { %v274_v14 = vrot.slane %v259_v10, %v1735_v8  ;;  %v278_v15 = vrot.slane %v259_v10, %v277_v9  ;;  %v291_v16 = vrot.slane %v1202_v11, %v1735_v8  ;;  %v295_v17 = vrot.slane %v1202_v11, %v277_v9 }
  0x50   : > { %1363 = vset.pattern.permute.xlu0 %v1534_v3  ;;  %1365 = vset.pattern.permute.xlu1 %v1535_v4  ;;  %v310_v18 = vrot.slane %v1203_v12, %v1735_v8  ;;  %v314_v19 = vrot.slane %v1203_v12, %v277_v9 }
  0x51   : > { %284 = vperm.xlu0 %1363, %v264_v0   ;;  %322 = vperm.xlu1 %1365, %v264_v0  }
  0x55   : > { %1366 = vset.pattern.permute.xlu0 %v1535_v4 }
  0xcb   : > { %v268_v13 = vpop.permute.xlu0 %267  ;;  %v304_v20 = vpop.permute.xlu1 %303 }
  0xcc   : > { %v281_v21 = vmul.f32 %v274_v14, %v268_v13  ;;  %v282_v22 = vmul.f32 %v278_v15, %v268_v13  ;;  %v317_v26 = vmul.f32 %v310_v18, %v304_v20  ;;  %v318_v27 = vmul.f32 %v314_v19, %v304_v20 }
  0xd0   : > { %v285_v23 = vpop.permute.xlu0 %284  ;;  %v323_v30 = vpop.permute.xlu1 %322 }
  0xd1   : > { %v298_v24 = vmul.f32 %v291_v16, %v285_v23  ;;  %v299_v25 = vmul.f32 %v295_v17, %v285_v23 }
  0xd3   : > { %v300_v28 = vadd.f32 %v298_v24, %v281_v21  ;;  %v301_v29 = vadd.f32 %v299_v25, %v282_v22 }
  0xd5   : > { %v319_v31 = vadd.f32 %v317_v26, %v300_v28  ;;  %v320_v32 = vadd.f32 %v318_v27, %v301_v29  ;;  %v1537_v26 = vmov 1966171168  }
  0xd6   : > { %v580_v27 = vunpack.c.l.s4 %v1537_v26 }
  0xd7   : > { %v325_v33 = vadd.f32 %v323_v30, %v319_v31  ;;  %v326_v34 = vadd.f32 %v323_v30, %v320_v32 }
  0xd9   : > { %vm327_vm0 = vcmp.lt.f32.partialorder %v325_v33, 0.0  ;;  %vm328_vm1 = vcmp.lt.f32.partialorder %v326_v34, 0.0 }
  0xda   : > { %v329_v35 = vsel %vm327_vm0, %v325_v33, -1.0  ;;  %v330_v36 = vsel %vm328_vm1, %v326_v34, -1.0  ;;  %v379_v63 = vsel %vm327_vm0, 1, %v1532_v1  ;;  %v380_v13 = vsel %vm328_vm1, 1, %v1532_v1 }
  0xdb   : > { %v333_v37 = vrot.slane %v329_v35, 2  ;;  %v334_v38 = vrot.slane %v330_v36, 2  ;;  %v345_v39 = vrot.slane %v329_v35, 1  ;;  %v346_v40 = vrot.slane %v330_v36, 1 }
  0xdc   : > { %v381_v18 = vrot.slane %v379_v63, 2  ;;  %v382_v21 = vrot.slane %v380_v13, 2 }
  0xdd   : > { %1367 = vrcp.f32 %v333_v37 }
  0xde   : > { %1369 = vrcp.f32 %v334_v38  ;;  %v581_v38 = vunpack.c.0.s8 %v580_v27 }
  0xdf   : > { %1371 = vrcp.f32 %v345_v39 }
  0xe0   : > { %1373 = vrcp.f32 %v346_v40 }
  0xe7   : > { %v1368_v41 = vpop.eup %1367 }
  0xe8   : > { %v1370_v42 = vpop.eup %1369  ;;  %v338_v43 = vmul.f32 %v1368_v41, %v325_v33 }
  0xe9   : > { %v1372_v44 = vpop.eup %1371  ;;  %v340_v45 = vmul.f32 %v1370_v42, %v326_v34 }
  0xea   : > { %v1374_v46 = vpop.eup %1373  ;;  %v341_v47 = vsub.f32 0.0, %v338_v43  ;;  %v350_v48 = vmul.f32 %v1372_v44, %v325_v33 }
  0xeb   : > { %v342_v49 = vsub.f32 0.0, %v340_v45  ;;  %v352_v50 = vmul.f32 %v1374_v46, %v326_v34 }
  0xec   : > { %v343_v51 = vadd.f32 16.0, %v341_v47  ;;  %vm359_vm2 = vcmp.ge.f32.partialorder %v350_v48, 0.0  ;;  %vm369_vm3 = vcmp.lt.f32.partialorder %v350_v48, 32.0  ;;  %v397_v52 = vmul.f32 0.0625, %v350_v48 }
  0xed   : > { %v344_v53 = vadd.f32 16.0, %v342_v49  ;;  %vm360_vm4 = vcmp.ge.f32.partialorder %v352_v50, 0.0  ;;  %v361_v54 = vsel %vm359_vm2, 1, %v1532_v1  ;;  %vm370_vm5 = vcmp.lt.f32.partialorder %v352_v50, 32.0 }
  0xee   : > { %vm353_vm6 = vcmp.ge.f32.partialorder %v343_v51, 0.0  ;;  %vm355_vm7 = vcmp.lt.f32.partialorder %v343_v51, 16.0  ;;  %v362_v55 = vsel %vm360_vm4, 1, %v1532_v1  ;;  %v363_v56 = vrot.slane %v361_v54, 1 }
  0xef   : > { %vm354_vm8 = vcmp.ge.f32.partialorder %v344_v53, 0.0  ;;  %vm356_vm9 = vcmp.lt.f32.partialorder %v344_v53, 16.0  ;;  %v364_v57 = vrot.slane %v362_v55, 1  ;;  %v371_v58 = vsel %vm369_vm3, 1, %v1532_v1  ;;  %vm1756_vm10 = vmand %vm353_vm6, %vm355_vm7 }
  0xf0   : > { %v372_v59 = vsel %vm370_vm5, 1, %v1532_v1  ;;  %v392_v60 = vmul.f32 0.125, %v343_v51  ;;  %vm1760_vm11 = vcmp.ne.s32.totalorder %v363_v56, 0  ;;  %v393_v0 = vmul.f32 0.125, %v344_v53  ;;  %vm1766_vm12 = vmand %vm354_vm8, %vm356_vm9 }
  0xf1   : > { %v398_v2 = vmul.f32 0.0625, %v352_v50  ;;  %vm1770_vm13 = vcmp.ne.s32.totalorder %v364_v57, 0  ;;  %v373_v9 = vrot.slane %v371_v58, 1  ;;  %v1208_v11 = vadd.f32 -1.0, %v397_v52  ;;  %vm367_vm14 = vmand %vm1756_vm10, %vm1760_vm11 }
  0xf2   : > { %v1206_v10 = vadd.f32 -1.0, %v392_v60  ;;  %v374_v12 = vrot.slane %v372_v59, 1  ;;  %v1207_v14 = vadd.f32 -1.0, %v393_v0  ;;  %vm368_vm15 = vmand %vm1766_vm12, %vm1770_vm13  ;;  %vm1792_vm4 = vcmp.ne.s32.totalorder %v381_v18, 0 }
  0xf3   : > { %v1209_v15 = vadd.f32 -1.0, %v398_v2  ;;  %v413_v17 = vadd.f32 1.0, %v1208_v11  ;;  %vm375_vm0 = vcmp.ne.s32.totalorder %v373_v9, 0  ;;  %vm384_vm5 = vcmp.ne.s32.totalorder %v382_v21, 0 }
  0xf4   : > { %v401_v16 = vadd.f32 1.0, %v1206_v10  ;;  %v402_v19 = vadd.f32 1.0, %v1207_v14  ;;  %vm376_vm1 = vcmp.ne.s32.totalorder %v374_v12, 0  ;;  %vm1784_vm2 = vmand %vm367_vm14, %vm375_vm0  ;;  %v1805_v47 = vadd.s32 8, %v1732_v7 }
  0xf5   : > { %v414_v20 = vadd.f32 1.0, %v1209_v15  ;;  %v415_v22 = vmul.f32 16.0, %v413_v17  ;;  %vm1788_vm3 = vmand %vm368_vm15, %vm376_vm1  ;;  %v1808_v48 = vadd.s32 16, %v1732_v7  ;;  %v1811_v51 = vadd.s32 24, %v1732_v7 }
  0xf6   : > { %v403_v1 = vmul.f32 32.0, %v401_v16  ;;  %v404_v24 = vmul.f32 32.0, %v402_v19  ;;  %vm385_vm6 = vmand %vm1784_vm2, %vm1792_vm4  ;;  %v1814_v52 = vsub.s32 %v581_v38, %v1732_v7 }
  0xf7   : > { %v416_v25 = vmul.f32 16.0, %v414_v20  ;;  %v1212_v30 = vadd.f32 -1.0, %v415_v22  ;;  %vm386_vm7 = vmand %vm1788_vm3, %vm384_vm5  ;;  %v1204_v43 = vsel %vm385_vm6, 1.0, %v1536_v5 }
  0xf8   : > { %v1210_v29 = vadd.f32 -1.0, %v403_v1  ;;  %v1211_v32 = vadd.f32 -1.0, %v404_v24  ;;  %v1205_v44 = vsel %vm386_vm7, 1.0, %v1536_v5  ;;  %v451_v57 = vrot.slane %v1204_v43, 7 }
  0xf9   : > { %v1213_v33 = vadd.f32 -1.0, %v416_v25  ;;  %v419_v35 = vmul.f32 0.5, %v1212_v30  ;;  %v452_v58 = vrot.slane %v1205_v44, 7 }
  0xfa   : > { %v407_v34 = vmul.f32 0.5, %v1210_v29  ;;  %v408_v36 = vmul.f32 0.5, %v1211_v32 }
  0xfb   : > { %v420_v37 = vmul.f32 0.5, %v1213_v33  ;;  %v421_v40 = vmax.f32 %v419_v35, 0.0 }
  0xfc   : > { %v409_v39 = vmax.f32 %v407_v34, 0.0  ;;  %v410_v41 = vmax.f32 %v408_v36, 0.0 }
  0xfd   : > { %v422_v42 = vmax.f32 %v420_v37, 0.0  ;;  %v423_v46 = vmin.f32 %v421_v40, 15.0 }
  0xfe   : > { %v411_v45 = vmin.f32 %v409_v39, 31.0  ;;  %v412_v49 = vmin.f32 %v410_v41, 31.0 }
  0xff   : > { %v424_v50 = vmin.f32 %v422_v42, 15.0  ;;  %v1816_v54 = vfloor.f32 %v423_v46 }
 0x100   : > { %v425_v53 = vfloor.f32 %v411_v45  ;;  %v426_v55 = vfloor.f32 %v412_v49 }
 0x101   : > { %v1818_v56 = vfloor.f32 %v424_v50  ;;  %v433_v60 = vsub.f32 %v423_v46, %v1816_v54  ;;  %v445_v62 = vadd.f32 1.0, %v1816_v54 }
 0x102   : > { %v429_v59 = vsub.f32 %v411_v45, %v425_v53  ;;  %v1248_v61 = vtrunc.f32 %v425_v53  ;;  %v430_v63 = vsub.f32 %v412_v49, %v426_v55  ;;  %v1250_v2 = vtrunc.f32 %v426_v55 }
 0x103   : > { %v434_v0 = vsub.f32 %v424_v50, %v1818_v56  ;;  %v446_v3 = vadd.f32 1.0, %v1818_v56  ;;  %v435_v9 = vsub.f32 1.0, %v433_v60  ;;  %v447_v11 = vmin.f32 %v445_v62, 15.0 }
 0x104   : > { %v431_v4 = vsub.f32 1.0, %v429_v59  ;;  %v1249_v10 = vcvt.f32.s32 %v1248_v61  ;;  %v432_v12 = vsub.f32 1.0, %v430_v63  ;;  %v1251_v14 = vcvt.f32.s32 %v1250_v2 }
 0x105   : > { %v436_v13 = vsub.f32 1.0, %v434_v0  ;;  %v448_v15 = vmin.f32 %v446_v3, 15.0  ;;  %v1824_v17 = vmul.f32 %v451_v57, %v435_v9  ;;  %v1826_v18 = vmul.f32 %v451_v57, %v433_v60 }
 0x106   : > { %v439_v16 = vadd.s32 1, %v1249_v10  ;;  %v1828_v19 = vmul.f32 %v452_v58, %v434_v0  ;;  %v440_v20 = vadd.s32 1, %v1251_v14  ;;  %v467_v1 = vrot.slane %v1249_v10, %v1735_v8 }
 0x107   : > { %v1830_v21 = vmul.f32 %v452_v58, %v436_v13  ;;  %v471_v22 = vrot.slane %v1251_v14, %v1735_v8  ;;  %v499_v23 = vrot.slane %v431_v4, %v1735_v8  ;;  %v503_v24 = vrot.slane %v432_v12, %v1735_v8 }
 0x108   : > { %vm441_vm8 = vcmp.lt.s32.totalorder %v439_v16, 31  ;;  %v547_v25 = vrot.slane %v429_v59, %v1735_v8  ;;  %vm443_vm9 = vcmp.lt.s32.totalorder %v440_v20, 31  ;;  %vm472_vm10 = vcmp.eq.s32.totalorder %v1732_v7, %v467_v1 }
 0x109   : > { %v442_v26 = vsel %vm441_vm8, %v439_v16, 31  ;;  %vm473_vm11 = vcmp.eq.s32.totalorder %v1732_v7, %v471_v22  ;;  %v444_v27 = vsel %vm443_vm9, %v440_v20, 31  ;;  %vm474_vm12 = vcmp.eq.s32.totalorder %v1805_v47, %v467_v1 }
 0x10a   : > { %vm475_vm13 = vcmp.eq.s32.totalorder %v1805_v47, %v471_v22  ;;  %vm476_vm14 = vcmp.eq.s32.totalorder %v1808_v48, %v467_v1  ;;  %vm477_vm15 = vcmp.eq.s32.totalorder %v1808_v48, %v471_v22  ;;  %vm478_vm0 = vcmp.eq.s32.totalorder %v1811_v51, %v467_v1 }
 0x10b   : > { %vm479_vm1 = vcmp.eq.s32.totalorder %v1811_v51, %v471_v22  ;;  %v1214_v28 = vsel %vm472_vm10, 1.0, %v1536_v5  ;;  %v1215_v29 = vsel %vm473_vm11, 1.0, %v1536_v5  ;;  %v1216_v30 = vsel %vm474_vm12, 1.0, %v1536_v5 }
 0x10c   : > { %v1217_v31 = vsel %vm475_vm13, 1.0, %v1536_v5  ;;  %v1218_v32 = vsel %vm476_vm14, 1.0, %v1536_v5  ;;  %v1219_v33 = vsel %vm477_vm15, 1.0, %v1536_v5  ;;  %v1220_v34 = vsel %vm478_vm0, 1.0, %v1536_v5 }
 0x10d   : > { %v1221_v35 = vsel %vm479_vm1, 1.0, %v1536_v5  ;;  %v504_v36 = vmul.f32 %v1214_v28, %v499_v23  ;;  %v505_v37 = vmul.f32 %v1215_v29, %v503_v24  ;;  %v506_v38 = vmul.f32 %v1216_v30, %v499_v23 }
 0x10e   : > { %v507_v39 = vmul.f32 %v1217_v31, %v503_v24  ;;  %v508_v40 = vmul.f32 %v1218_v32, %v499_v23  ;;  %v509_v41 = vmul.f32 %v1219_v33, %v503_v24  ;;  %v510_v42 = vmul.f32 %v1220_v34, %v499_v23 }
 0x10f   : > { %v511_v43 = vmul.f32 %v1221_v35, %v503_v24  ;;  %v515_v44 = vrot.slane %v442_v26, %v1735_v8  ;;  %v519_v45 = vrot.slane %v444_v27, %v1735_v8  ;;  %v551_v46 = vrot.slane %v430_v63, %v1735_v8 }
 0x110   : > { %v578_v49 = vcombine.low %v1816_v54, %v1818_v56  ;;  %v603_v50 = vcombine.low %v447_v11, %v448_v15  ;;  %v625_v1 = vcombine.low %v1824_v17, %v1830_v21  ;;  %v647_v22 = vcombine.low %v1826_v18, %v1828_v19 }
 0x111   : > { %vm520_vm2 = vcmp.eq.s32.totalorder %v1732_v7, %v515_v44  ;;  %vm522_vm3 = vcmp.eq.s32.totalorder %v1805_v47, %v515_v44  ;;  %vm524_vm4 = vcmp.eq.s32.totalorder %v1808_v48, %v515_v44  ;;  %vm526_vm5 = vcmp.eq.s32.totalorder %v1811_v51, %v515_v44 }
 0x112   : > { %vm521_vm6 = vcmp.eq.s32.totalorder %v1732_v7, %v519_v45  ;;  %vm523_vm7 = vcmp.eq.s32.totalorder %v1805_v47, %v519_v45  ;;  %vm525_vm8 = vcmp.eq.s32.totalorder %v1808_v48, %v519_v45  ;;  %vm527_vm9 = vcmp.eq.s32.totalorder %v1811_v51, %v519_v45 }
 0x113   : > { %v1222_v8 = vsel %vm520_vm2, 1.0, %v1536_v5  ;;  %v1223_v53 = vsel %vm521_vm6, 1.0, %v1536_v5  ;;  %v1224_v54 = vsel %vm522_vm3, 1.0, %v1536_v5  ;;  %v1225_v55 = vsel %vm523_vm7, 1.0, %v1536_v5 }
 0x114   : > { %v1226_v56 = vsel %vm524_vm4, 1.0, %v1536_v5  ;;  %v1227_v57 = vsel %vm525_vm8, 1.0, %v1536_v5  ;;  %v1228_v7 = vsel %vm526_vm5, 1.0, %v1536_v5  ;;  %v1229_v47 = vsel %vm527_vm9, 1.0, %v1536_v5 }
 0x115   : > { %v552_v58 = vmul.f32 %v1222_v8, %v547_v25  ;;  %v553_v48 = vmul.f32 %v1223_v53, %v551_v46  ;;  %v554_v59 = vmul.f32 %v1224_v54, %v547_v25  ;;  %v555_v51 = vmul.f32 %v1225_v55, %v551_v46 }
 0x116   : > { %v556_v60 = vmul.f32 %v1226_v56, %v547_v25  ;;  %v557_v61 = vmul.f32 %v1227_v57, %v551_v46  ;;  %v558_v62 = vmul.f32 %v1228_v7, %v547_v25  ;;  %v559_v63 = vmul.f32 %v1229_v47, %v551_v46 }
 0x117   : > { %v560_v0 = vadd.f32 %v552_v58, %v504_v36  ;;  %v561_v2 = vadd.f32 %v553_v48, %v505_v37  ;;  %v562_v3 = vadd.f32 %v554_v59, %v506_v38  ;;  %v563_v4 = vadd.f32 %v555_v51, %v507_v39 }
 0x118   : > { %v564_v9 = vadd.f32 %v556_v60, %v508_v40  ;;  %v565_v10 = vadd.f32 %v557_v61, %v509_v41  ;;  %v566_v11 = vadd.f32 %v558_v62, %v510_v42  ;;  %v567_v12 = vadd.f32 %v559_v63, %v511_v43 }
 0x119   : > { %v568_v13 = vpack.c.bf16 %v562_v3, %v560_v0  ;;  %v569_v14 = vpack.c.bf16 %v563_v4, %v561_v2  ;;  %v585_v5 = vrot.slane %v578_v49, %v1814_v52  ;;  %v610_v15 = vrot.slane %v603_v50, %v1814_v52 }
 0x11a   : > { %v570_v16 = vpack.c.bf16 %v566_v11, %v564_v9  ;;  %v571_v20 = vpack.c.bf16 %v567_v12, %v565_v10  ;;  %vm597_vm10 = vcmp.lt.s32.totalorder %v271_v6, 256  ;;  %v632_v25 = vrot.slane %v625_v1, %v1814_v52 }
 0x11b   : > { %572 = vst [vmem:[#allocation2] sm:$0xff] %v568_v13  ;;  %573 = vst [vmem:[#allocation2 + $0x8] sm:$0xff] %v569_v14  ;;  %v586_v23 = vcombine.high %v585_v5, %v585_v5  ;;  %v611_v24 = vcombine.high %v610_v15, %v610_v15  ;;  %v654_v26 = vrot.slane %v647_v22, %v1814_v52 }
 0x11c   : > { %574 = vst [vmem:[#allocation2 + $0x10] sm:$0xff] %v570_v16  ;;  %575 = vst [vmem:[#allocation2 + $0x18] sm:$0xff] %v571_v20  ;;  %v633_v17 = vcombine.high %v632_v25, %v632_v25 }
 0x11d   : > { %v593_v27 = vrot.slane %v586_v23, %v1814_v52  ;;  %v618_v28 = vrot.slane %v611_v24, %v1814_v52  ;;  %v655_v21 = vcombine.high %v654_v26, %v654_v26 }
 0x11e   : > { %v640_v18 = vrot.slane %v633_v17, %v1814_v52 }
 0x11f   : > { %599 = vst.msk [vmem:[#allocation3] ss:$8 sm:$0x3] %vm597_vm10, %v593_v27  ;;  %621 = vst.msk [vmem:[#allocation3 + $0x1] ss:$8 sm:$0x3] %vm597_vm10, %v618_v28  ;;  %v662_v19 = vrot.slane %v655_v21, %v1814_v52 }
 0x120   : > { %643 = vst.msk [vmem:[#allocation3 + $0x2] ss:$8 sm:$0x3] %vm597_vm10, %v640_v18 }
 0x121   : > { %665 = vst.msk [vmem:[#allocation3 + $0x3] ss:$8 sm:$0x3] %vm597_vm10, %v662_v19 }
 0x122 PF: > { %v674_v6 = vlaneseq  ;;  %s1230_s15 = sshll.u32 %s1513_s18, 3  ;;  %v1538_v38 = vmov 1966171168   ;;  %v1894_v39 = vld [vmem:[%s209_s28] sm:$0xff]  ;;  %v1539_v54 = vmov 0.0   ;;  %v1910_v20 = vld [vmem:[#allocation2 + $0x8] sm:$0xff] }
 0x123   : > { %v677_v33 = vstv %s1230_s15  ;;  %v752_v52 = vunpack.c.l.s4 %v1538_v38  ;;  %v1241_v40 = vcombine.high %v1894_v39, %v1894_v39  ;;  %v1912_v1 = vld [vmem:[#allocation2] sm:$0xff]  ;;  %v1914_v22 = vld [vmem:[#allocation2 + $0x18] sm:$0xff]  ;;  %v1921_v18 = vld [vmem:[#allocation2 + $0x10] sm:$0xff]  ;;  %s1247_s18 = sshll.u32 %s1517_s19, 8  ;;  %s1071_s29 = sshll.u32 %s1723_s24, 4  ;;  %s1997_s29 = int_to_ptr.vmem [resolvable:$true] %s1071_s29 }
 0x124   : > { %v675_v30 = vshrl.u32 %v674_v6, 7  ;;  %s1995_s11 = scalar_lea.hbm %s2064_s3, %s1247_s18  ;;  %s1055_s19 = scalar_lea.sflag [#allocation6], %s238_s9 }
 0x125   : > { %1039 = vmatprep.mubr.bf16.mxu0 %v1241_v40  ;;  %v753_v53 = vunpack.c.0.s8 %v752_v52  ;;  %s1407_s27 = scalar_lea.vmem %s1997_s29, 256  ;;  %p2092_p4 = scmp.ne.s32.totalorder %s2072_s7, 0 }
 0x126   : > { %v667_v29 = vld [vmem:[#allocation3] ss:$8 sm:$0x3]  ;;  %v669_v31 = vld [vmem:[#allocation3 + $0x1] ss:$8 sm:$0x3]  ;;  %v678_v35 = vadd.s32 %v677_v33, %v675_v30  ;;  %p1408_p7 = scmp.ne.s32.totalorder %s1997_s29, %s1407_s27 }
 0x127   : > { %v671_v32 = vld [vmem:[#allocation3 + $0x2] ss:$8 sm:$0x3]  ;;  %v1888_v36 = vsub.s32 0, %v675_v30  ;;  %v1890_v37 = vsub.s32 1, %v675_v30  ;;  %v756_v61 = vsub.s32 %v753_v53, %v675_v30  ;;  %s1540_s4 = smov [#allocation7]  }
 0x128   : > { %v673_v34 = vld [vmem:[#allocation3 + $0x3] ss:$8 sm:$0x3]  ;;  %v679_v41 = vcvt.s32.f32 %v678_v35  ;;  %p1409_p10 = pnand %p1408_p7, %p2092_p4  ;;  %s1411_s25 = sshll.u32 %s1540_s4, 4  ;;  %s1412_s25 = int_to_ptr.vmem [resolvable:$false] %s1411_s25 }
 0x129   : > { %v684_v42 = vrot.slane %v667_v29, %v1888_v36  ;;  %v688_v43 = vrot.slane %v667_v29, %v1890_v37  ;;  %v701_v44 = vrot.slane %v671_v32, %v1888_v36  ;;  %v705_v45 = vrot.slane %v671_v32, %v1890_v37  ;;  %s1413_s26 = scalar_lea.vmem %s1412_s25, 512  ;;  %p1414_p8 = scmp.lt.s32.totalorder %s1997_s29, %s1412_s25 }
 0x12a   : > { %v714_v46 = vrot.slane %v669_v31, %v1888_v36  ;;  %v718_v49 = vrot.slane %v669_v31, %v1890_v37  ;;  %v731_v50 = vrot.slane %v673_v34, %v1888_v36  ;;  %v735_v8 = vrot.slane %v673_v34, %v1890_v37  ;;  %p1410_p1 = pneg %p1409_p10  ;;  %p1415_p9 = scmp.lt.s32.totalorder %s1413_s26, %s1407_s27 }
 0x12b   : > { %vm691_vm11 = vcmp.eq.f32.partialorder %v679_v41, %v684_v42  ;;  %vm692_vm12 = vcmp.eq.f32.partialorder %v679_v41, %v688_v43 }
 0x12c   : > { %v1231_v55 = vsel %vm691_vm11, 1.0, %v1539_v54  ;;  %v1232_v56 = vsel %vm692_vm12, 1.0, %v1539_v54  ;;  %vm721_vm13 = vcmp.eq.f32.partialorder %v679_v41, %v714_v46  ;;  %vm722_vm14 = vcmp.eq.f32.partialorder %v679_v41, %v718_v49  ;;  %p1416_p11 = por %p1415_p9, %p1414_p8 }
 0x12d   : > { %v708_v57 = vmul.f32 %v1231_v55, %v701_v44  ;;  %v709_v7 = vmul.f32 %v1232_v56, %v705_v45  ;;  %v1233_v47 = vsel %vm721_vm13, 1.0, %v1539_v54  ;;  %v1234_v58 = vsel %vm722_vm14, 1.0, %v1539_v54 }
 0x12e   : > { %v738_v48 = vmul.f32 %v1233_v47, %v731_v50  ;;  %v739_v59 = vmul.f32 %v1234_v58, %v735_v8  ;;  %p1417_p13 = pnand %p1416_p11, %p1410_p1 }
 0x130   : > { %v740_v51 = vadd.f32 %v738_v48, %v708_v57  ;;  %v741_v60 = vadd.f32 %v739_v59, %v709_v7 }
 0x132   : > { %v1235_v62 = vpack.c.bf16 %v741_v60, %v740_v51 }
 0x134   : > { %v757_v63 = vrot.slane %v1235_v62, %v756_v61 }
 0x136   : > { %v758_v0 = vcombine.high %v757_v63, %v757_v63  ;;  %v765_v2 = vrot.slane %v757_v63, %v756_v61 }
 0x138   : > { %v1236_v3 = vpack.i.b16 %v765_v2, %v765_v2  ;;  %v776_v4 = vunpack.i.h.s16 %v765_v2  ;;  %v772_v9 = vrot.slane %v758_v0, %v756_v61  ;;  %v773_v44 = vcombine.high %v765_v2, %v765_v2 }
 0x13a   : > { %v798_v10 = vrot.slane %v1236_v3, %v1890_v37  ;;  %v794_v11 = vrot.slane %v1236_v3, %v1888_v36  ;;  %v784_v12 = vpack.i.b16 %v776_v4, %v776_v4  ;;  %v1237_v13 = vpack.i.b16 %v772_v9, %v772_v9 }
 0x13b   : > { %v778_v27 = vunpack.i.h.s16 %v772_v9  ;;  %v774_v35 = vcombine.high %v772_v9, %v772_v9  ;;  %v1238_v55 = vpack.i.b16 %v773_v44, %v773_v44  ;;  %v780_v47 = vunpack.i.h.s16 %v773_v44 }
 0x13c   : > { %v863_v14 = vpack.i.b16 %v798_v10, %v798_v10  ;;  %v856_v5 = vpack.i.b16 %v794_v11, %v794_v11  ;;  %v806_v15 = vrot.slane %v784_v12, %v1890_v37  ;;  %v802_v16 = vrot.slane %v784_v12, %v1888_v36 }
 0x13d   : > { %v814_v19 = vrot.slane %v1237_v13, %v1890_v37  ;;  %v810_v31 = vrot.slane %v1237_v13, %v1888_v36  ;;  %v786_v34 = vpack.i.b16 %v778_v27, %v778_v27  ;;  %v782_v38 = vunpack.i.h.s16 %v774_v35 }
 0x13e   : > { %v868_v23 = vrot.slane %v863_v14, %v1888_v36  ;;  %v861_v24 = vrot.slane %v856_v5, %v1888_v36  ;;  %v877_v25 = vpack.i.b16 %v806_v15, %v806_v15  ;;  %v870_v26 = vpack.i.b16 %v802_v16, %v802_v16 }
 0x13f   : > { %v891_v33 = vpack.i.b16 %v814_v19, %v814_v19  ;;  %v884_v40 = vpack.i.b16 %v810_v31, %v810_v31  ;;  %v822_v43 = vrot.slane %v786_v34, %v1890_v37  ;;  %v1933_v45 = vpack.i.b16 %v782_v38, %v782_v38 }
 0x140   : > { %v968_v28 = vmul.bf16 %v868_v23, %v1910_v20  ;;  %v967_v17 = vmul.bf16 %v861_v24, %v1912_v1  ;;  %v970_v21 = vmul.bf16 %v868_v23, %v1914_v22  ;;  %v882_v6 = vrot.slane %v877_v25, %v1888_v36 }
 0x141   : > { %v969_v29 = vmul.bf16 %v861_v24, %v1921_v18  ;;  %v875_v30 = vrot.slane %v870_v26, %v1888_v36  ;;  %v896_v42 = vrot.slane %v891_v33, %v1888_v36  ;;  %v889_v49 = vrot.slane %v884_v40, %v1888_v36 }
 0x142   : > { %1007 = vmatprep.subr.bf16.mxu0 %v968_v28  ;;  %v972_v32 = vmul.bf16 %v882_v6, %v1910_v20  ;;  %v974_v41 = vmul.bf16 %v882_v6, %v1914_v22  ;;  %v818_v50 = vrot.slane %v786_v34, %v1888_v36  ;;  %v854_v8 = vrot.slane %v1933_v45, %v1890_v37 }
 0x143   : > { %1008 = vmatpush1.bf16.msra.mxu0 %v967_v17  ;;  %v971_v52 = vmul.bf16 %v875_v30, %v1912_v1  ;;  %v973_v46 = vmul.bf16 %v875_v30, %v1921_v18  ;;  %v976_v53 = vmul.bf16 %v896_v42, %v1910_v20  ;;  %v905_v54 = vpack.i.b16 %v822_v43, %v822_v43 }
 0x144   : > { %1009 = vmatprep.subr.bf16.mxu0 %v970_v21  ;;  %v961_v56 = vpack.i.b16 %v854_v8, %v854_v8  ;;  %v975_v57 = vmul.bf16 %v889_v49, %v1912_v1  ;;  %v898_v7 = vpack.i.b16 %v818_v50, %v818_v50  ;;  %v978_v58 = vmul.bf16 %v896_v42, %v1914_v22 }
 0x145   : > { %v910_v48 = vrot.slane %v905_v54, %v1888_v36  ;;  %v830_v59 = vrot.slane %v1238_v55, %v1890_v37  ;;  %v977_v60 = vmul.bf16 %v889_v49, %v1921_v18  ;;  %v826_v62 = vrot.slane %v1238_v55, %v1888_v36  ;;  %v1049_v49 = vld [vmem:[%s1723_s24 + $0x8] sm:$0xff] }
 0x146   : > { %v1946_v51 = vrot.slane %v961_v56, %v1888_v36  ;;  %v903_v61 = vrot.slane %v898_v7, %v1888_v36  ;;  %v788_v2 = vpack.i.b16 %v780_v47, %v780_v47  ;;  %v1239_v16 = vpack.i.b16 %v774_v35, %v774_v35 }
 0x147   : > { %1010 = vmatpush1.bf16.msra.mxu0 %v969_v29  ;;  %v980_v63 = vmul.bf16 %v910_v48, %v1910_v20  ;;  %v919_v0 = vpack.i.b16 %v830_v59, %v830_v59  ;;  %v912_v4 = vpack.i.b16 %v826_v62, %v826_v62  ;;  %v982_v9 = vmul.bf16 %v910_v48, %v1914_v22 }
 0x148   : > { %1011 = vmatprep.subr.bf16.mxu0 %v972_v32  ;;  %v979_v3 = vmul.bf16 %v903_v61, %v1912_v1  ;;  %v838_v11 = vrot.slane %v788_v2, %v1890_v37  ;;  %v981_v12 = vmul.bf16 %v903_v61, %v1921_v18  ;;  %v834_v14 = vrot.slane %v788_v2, %v1888_v36 }
 0x149   : > { %v924_v10 = vrot.slane %v919_v0, %v1888_v36  ;;  %v917_v13 = vrot.slane %v912_v4, %v1888_v36  ;;  %v846_v27 = vrot.slane %v1239_v16, %v1890_v37  ;;  %v842_v21 = vrot.slane %v1239_v16, %v1888_v36 }
 0x14a   : > { %v933_v15 = vpack.i.b16 %v838_v11, %v838_v11  ;;  %v926_v24 = vpack.i.b16 %v834_v14, %v834_v14  ;;  %v850_v34 = vrot.slane %v1933_v45, %v1888_v36  ;;  %v996_v43 = vmul.bf16 %v1946_v51, %v1910_v20 }
 0x14b   : > { %1012 = vmatpush1.bf16.msra.mxu0 %v971_v52  ;;  %v984_v5 = vmul.bf16 %v924_v10, %v1910_v20  ;;  %v983_v23 = vmul.bf16 %v917_v13, %v1912_v1  ;;  %v986_v25 = vmul.bf16 %v924_v10, %v1914_v22  ;;  %v985_v28 = vmul.bf16 %v917_v13, %v1921_v18 }
 0x14c   : > { %1013 = vmatprep.subr.bf16.mxu0 %v974_v41  ;;  %v938_v26 = vrot.slane %v933_v15, %v1888_v36  ;;  %v931_v17 = vrot.slane %v926_v24, %v1888_v36  ;;  %v947_v6 = vpack.i.b16 %v846_v27, %v846_v27  ;;  %v940_v30 = vpack.i.b16 %v842_v21, %v842_v21 }
 0x14d   : > { %v954_v52 = vpack.i.b16 %v850_v34, %v850_v34  ;;  %v998_v45 = vmul.bf16 %v1946_v51, %v1914_v22 }
 0x14e   : > { %v988_v19 = vmul.bf16 %v938_v26, %v1910_v20  ;;  %v987_v29 = vmul.bf16 %v931_v17, %v1912_v1  ;;  %v990_v31 = vmul.bf16 %v938_v26, %v1914_v22  ;;  %v952_v37 = vrot.slane %v947_v6, %v1888_v36 }
 0x14f   : > { %1014 = vmatpush1.bf16.msra.mxu0 %v973_v46  ;;  %v989_v32 = vmul.bf16 %v931_v17, %v1921_v18  ;;  %v945_v33 = vrot.slane %v940_v30, %v1888_v36  ;;  %v959_v42 = vrot.slane %v954_v52, %v1888_v36  ;;  %v1240_v36 = vcombine.low %v1894_v39, %v1894_v39 }
 0x150   : > { %1015 = vmatprep.subr.bf16.mxu0 %v976_v53  ;;  %v992_v35 = vmul.bf16 %v952_v37, %v1910_v20  ;;  %v994_v40 = vmul.bf16 %v952_v37, %v1914_v22  ;;  %v1048_v20 = vld [vmem:[%s1723_s24] sm:$0xff] }
 0x151   : > { %v991_v38 = vmul.bf16 %v945_v33, %v1912_v1  ;;  %v993_v41 = vmul.bf16 %v945_v33, %v1921_v18  ;;  %v995_v44 = vmul.bf16 %v959_v42, %v1912_v1  ;;  %v997_v46 = vmul.bf16 %v959_v42, %v1921_v18 }
 0x153   : > { %1016 = vmatpush1.bf16.msra.mxu0 %v975_v57 }
 0x154   : > { %1017 = vmatprep.subr.bf16.mxu0 %v978_v58 }
 0x157   : > { %1018 = vmatpush1.bf16.msra.mxu0 %v977_v60 }
 0x158   : > { %1019 = vmatprep.subr.bf16.mxu0 %v980_v63 }
 0x15b   : > { %1020 = vmatpush1.bf16.msra.mxu0 %v979_v3 }
 0x15c   : > { %1021 = vmatprep.subr.bf16.mxu0 %v982_v9 }
 0x15f   : > { %1022 = vmatpush1.bf16.msra.mxu0 %v981_v12 }
 0x160   : > { %1023 = vmatprep.subr.bf16.mxu0 %v984_v5 }
 0x163   : > { %1024 = vmatpush1.bf16.msra.mxu0 %v983_v23 }
 0x164   : > { %1025 = vmatprep.subr.bf16.mxu0 %v986_v25 }
 0x167   : > { %1026 = vmatpush1.bf16.msra.mxu0 %v985_v28 }
 0x168   : > { %1027 = vmatprep.subr.bf16.mxu0 %v988_v19 }
 0x16b   : > { %1028 = vmatpush1.bf16.msra.mxu0 %v987_v29 }
 0x16c   : > { %1029 = vmatprep.subr.bf16.mxu0 %v990_v31 }
 0x16f   : > { %1030 = vmatpush1.bf16.msra.mxu0 %v989_v32 }
 0x170   : > { %1031 = vmatprep.subr.bf16.mxu0 %v992_v35 }
 0x173   : > { %1032 = vmatpush1.bf16.msra.mxu0 %v991_v38 }
 0x174   : > { %1033 = vmatprep.subr.bf16.mxu0 %v994_v40 }
 0x177   : > { %1034 = vmatpush1.bf16.msra.mxu0 %v993_v41 }
 0x178   : > { %1035 = vmatprep.subr.bf16.mxu0 %v996_v43 }
 0x17b   : > { %1036 = vmatpush1.bf16.msra.mxu0 %v995_v44 }
 0x17c   : > { %1037 = vmatprep.subr.bf16.mxu0 %v998_v45 }
 0x17f   : > { %1038 = vmatpush1.bf16.msra.mxu0 %v997_v46 }
 0x182   : > { %1040 = vmatmul.mubr.bf16.vlgmr.msra.gmra.mrb[0].mxu0 %v1240_v36 }
 0x255   : > { %v1041_v1 = vpop.f32.mrb[0].mxu0 }
 0x256   : > { %v1050_v50 = vadd.f32 %v1048_v20, %v1041_v1  ;;  %v1043_v22 = vpop.f32.mrb[1].mxu0 }
 0x257   : > { %v1051_v8 = vadd.f32 %v1049_v49, %v1043_v22  ;;  %v1045_v53 = vpop.f32.mrb[2].mxu0 }
 0x258   : > { %1052 = vst [vmem:[%s1723_s24] sm:$0xff] %v1050_v50  ;;  %v1046_v39 = vpop.f32.mrb[3].mxu0 }
 0x259   : > { %1053 = vst [vmem:[%s1723_s24 + $0x8] sm:$0xff] %v1051_v8 }
 0x25a   : > { %1420 = shalt.err (!%p1417_p13)
}
 0x25b   : > { %s1421_s9 = scalar_lea.hbm %s1995_s11, 256  ;;  %s1425_s6 = scalar_lea.hbm %s2064_s3, 512 }
 0x25c   : > { %p1422_p0 = scmp.ne.s32.totalorder %s1995_s11, %s1421_s9  ;;  %p1426_p3 = scmp.lt.u32.totalorder %s1995_s11, %s2064_s3 }
 0x25d   : > { %p1427_p12 = scmp.lt.u32.totalorder %s1425_s6, %s1421_s9  ;;  %p1429_p7 = scmp.lt.u32.totalorder %s1421_s9, %s1995_s11 }
 0x25e   : > { %p1423_p5 = pnand %p1422_p0, %p2092_p4 }
 0x25f   : > { %p1428_p2 = por %p1427_p12, %p1426_p3 }
 0x260   : > { %p1424_p6 = pneg %p1423_p5 }
 0x261   : > { %p1430_p10 = por %p1429_p7, %p1428_p2 }
 0x263   : > { %p1431_p1 = pnand %p1430_p10, %p1424_p6 }
 0x265   : > { %1434 = shalt.err (!%p1431_p1)
}
 0x266   : > { %1254 = dma.vmem_to_hbm [thread:$0]  (%p2092_p4), %s1997_s29, 256, %s1995_s11, %s1055_s19  }
 0x267 PF: > { %p1265_p8 = scmp.ge.s32.totalorder %s1529_s22, 2  ;;  %s1083_s18 = sand.u32 1, %s1489_s12  }
 0x268   : > { %p2093_p9 = scmp.ne.s32.totalorder %s2074_s10, 0  ;;  %s1084_s28 = scalar_lea.sflag [#allocation6], %s1083_s18 }
 0x26a   : > { %p1261_p11 = pnand %p1265_p8, %p2093_p9 }
 0x26c   : > { %1484 = dma.done.wait (!%p1261_p11), %s1084_s28, 256  }
 0x26d   : > { %1486 = vsyncadd (!%p1261_p11), %s1084_s28, 4294967040  ;;  %s19_s22 = sadd.s32 1, %s1529_s22   ;;  %s2094_s7 = sld [smem:[#allocation12_spill]] }
 0x26e   : > { %p16_p13 = scmp.ge.s32.totalorder %s19_s22, 6   ;;  %s2095_s29 = sld [smem:[#allocation10_spill]] }
 0x26f   : > { %s2096_s5 = sld [smem:[#allocation11_spill]]  ;;  %s2097_s12 = smov %s1493_s13 }
 0x270   : > { %s2098_s13 = smov %s1497_s14  ;;  %s2099_s14 = smov %s1648_s8 }
 0x271   : > { %s2100_s15 = smov %s1505_s16  ;;  %s2101_s16 = smov %s1509_s17 }
 0x272   : > { %s2103_s18 = smov %s1521_s20  ;;  %s2104_s19 = smov %s1525_s21 }
 0x273   : > { %s2102_s17 = smov %s2094_s7  ;;  %18 = sbr.rel (!%p16_p13) target bundleno = 9 (0x9), region = 95 }
 0x274   : > { %s2105_s20 = smov %s2095_s29 }
 0x275   : > { %s2106_s21 = smov %s2096_s5 }
 0x27a   :  { %1089 = vsyncpa [#allocation5], 1 }
 0x27b   :  { %1091 = vsyncpa [#allocation5 + $0x1], 1 }
 0x27c   :  { %1092 = vsyncpa [#allocation6], 1 }
 0x27d   :  { %1094 = vsyncpa [#allocation6 + $0x1], 1 }

</bundles_post_ra>
